<compile_context>
chip_gen: v7x
topology: tpu7x:2x2x1
jax: 0.10.0
libtpu: 0.0.40
codegen_flags: <defaults>
</compile_context>

<pallas_src>
import functools

import jax
import jax.numpy as jnp
import numpy as np
from jax.experimental import pallas as pl
from jax.experimental.pallas import tpu as pltpu


def _dense_block_kernel(num_convs, h, w, cins, cout, x_ref, mask_ref, *rest):
    """Fused DenseBlock forward.

    Channel-major layout, spatial flattened on the lane axis.
      x_ref:       (cins[0], NHW)   input feature map
      mask_ref:    (9, NHW)         f32 validity mask per 3x3 tap
      per block i: gamma (cins[i],1), beta (cins[i],1),
                   w_mat (cout, 9*cins[i]), bias (cout,1)
      out_ref:     (cins[-1], NHW)  running dense-concat feature map (output)
      patches_ref: (9*max_cin, NHW) VMEM im2col staging buffer
    """
    out_ref, patches_ref = rest[-2], rest[-1]
    block_refs = rest[:-2]
    nhw = x_ref.shape[1]

    # Static 3x3 tap offsets in the flattened (n, h, w) spatial index.
    offsets = [dh * w + dw for dh in (-1, 0, 1) for dw in (-1, 0, 1)]

    # Seed the dense concat with the input channels.
    out_ref[0:cins[0], :] = x_ref[...]

    for i in range(num_convs):
        cin = cins[i]
        gamma_ref, beta_ref, w_ref, bias_ref = block_refs[4 * i:4 * i + 4]

        x = out_ref[0:cin, :]                               # (cin, NHW), lane-dense

        # BatchNorm2d (training-mode, biased batch variance), one pass over lanes.
        mean = jnp.mean(x, axis=1, keepdims=True)           # (cin, 1)
        var = jnp.mean(x * x, axis=1, keepdims=True) - mean * mean
        inv = jax.lax.rsqrt(var + 1e-5)
        act = jnp.maximum((x - mean) * (inv * gamma_ref[...]) + beta_ref[...], 0.0)

        # im2col: 9 spatially shifted, boundary-masked copies -> (9*cin, NHW).
        # pltpu.roll runs on the XLU; the mask multiply is a cheap VPU op.
        for t, off in enumerate(offsets):
            shifted = act if off == 0 else pltpu.roll(act, shift=(-off) % nhw, axis=1)
            patches_ref[t * cin:(t + 1) * cin, :] = shifted * mask_ref[t:t + 1, :]

        # One MXU matmul per block: (cout, 9*cin) @ (9*cin, NHW) + bias.
        y = jnp.dot(w_ref[...], patches_ref[0:9 * cin, :],
                    preferred_element_type=jnp.float32) + bias_ref[...]

        # Dense concat: append this block's output channels.
        out_ref[cin:cin + cout, :] = y


def dense_block_pallas(x_nchw, params):
    """DenseBlock forward. x_nchw: (N, C0, H, W); params: [(gamma, beta, w_hwio, bias), ...]."""
    n, c0, h, w = x_nchw.shape
    nhw = n * h * w
    num_convs = len(params)
    cout = params[0][2].shape[-1]
    cins = tuple(c0 + i * cout for i in range(num_convs + 1))
    c_total = cins[-1]

    # Channel-major, flattened spatial on lanes (NHW = 256 -> lane-dense).
    x_cm = jnp.transpose(x_nchw, (1, 0, 2, 3)).reshape(c0, nhw)

    # Host-side prep: 3x3 SAME-conv tap validity masks over the flattened spatial axis.
    rr = (np.arange(nhw) // w) % h
    cc = np.arange(nhw) % w
    masks = [((rr + dh >= 0) & (rr + dh < h) & (cc + dw >= 0) & (cc + dw < w))
             for dh in (-1, 0, 1) for dw in (-1, 0, 1)]
    tap_mask = jnp.asarray(np.stack(masks).astype(np.float32))      # (9, NHW)

    inputs = [x_cm, tap_mask]
    for i, (gamma, beta, w_hwio, bias) in enumerate(params):
        cin = cins[i]
        # HWIO (3,3,cin,cout) -> (cout, 9*cin); k = (kh*3 + kw)*cin + c matches tap order.
        w_mat = w_hwio.reshape(9 * cin, cout).T
        inputs += [gamma.reshape(cin, 1), beta.reshape(cin, 1), w_mat,
                   bias.reshape(cout, 1)]

    vmem = pl.BlockSpec(memory_space=pltpu.MemorySpace.VMEM)
    kernel = functools.partial(_dense_block_kernel, num_convs, h, w, cins, cout)
    # NOTE: at real DenseNet sizes, tile the spatial axis over a parallel grid (with a
    # 1-row halo) so the working set fits v7x's 64 MiB VMEM and shards across its two
    # TensorCores; at this toy size everything fits comfortably in one VMEM tile.
    out_cm = pl.pallas_call(
        kernel,
        out_shape=jax.ShapeDtypeStruct((c_total, nhw), jnp.float32),
        in_specs=[vmem] * len(inputs),
        out_specs=vmem,
        scratch_shapes=[pltpu.VMEM((9 * cins[num_convs - 1], nhw), jnp.float32)],
    )(*inputs)

    return jnp.transpose(out_cm.reshape(c_total, n, h, w), (1, 0, 2, 3))


# ---------------- pure-JAX reference (for verification) ----------------
def _ref_conv_block(x, gamma, beta, w, b):  # NHWC / HWIO
    mean = x.mean(axis=(0, 1, 2), keepdims=True)
    var = ((x - mean) ** 2).mean(axis=(0, 1, 2), keepdims=True)
    xhat = (x - mean) / jnp.sqrt(var + 1e-5) * gamma + beta
    act = jnp.maximum(xhat, 0.0)
    y = jax.lax.conv_general_dilated(
        act, w, window_strides=(1, 1), padding="SAME",
        dimension_numbers=("NHWC", "HWIO", "NHWC"))
    return y + b


def dense_block_ref(x_nchw, params):
    x = jnp.transpose(x_nchw, (0, 2, 3, 1))
    for gamma, beta, w, b in params:
        y = _ref_conv_block(x, gamma, beta, w, b)
        x = jnp.concatenate([x, y], axis=-1)
    return jnp.transpose(x, (0, 3, 1, 2))


if __name__ == "__main__":
    # Module instantiation from the reference: DenseBlock(2, 3, 10), X = randn(4, 3, 8, 8)
    num_convs = 2
    input_channels = 3
    num_channels = 10
    N, H, W = 4, 8, 8

    key = jax.random.PRNGKey(0)
    key, kx = jax.random.split(key)
    X = jax.random.normal(kx, (N, input_channels, H, W), dtype=jnp.float32)

    # Deterministic parameter init (gamma=1, beta=0; small random conv weights/bias).
    params = []
    for i in range(num_convs):
        cin = input_channels + i * num_channels
        key, kw, kb = jax.random.split(key, 3)
        gamma = jnp.ones((cin,), jnp.float32)
        beta = jnp.zeros((cin,), jnp.float32)
        w = 0.1 * jax.random.normal(kw, (3, 3, cin, num_channels), dtype=jnp.float32)  # HWIO
        b = 0.1 * jax.random.normal(kb, (num_channels,), dtype=jnp.float32)
        params.append((gamma, beta, w, b))

    out = dense_block_pallas(X, params)
    out = jax.block_until_ready(out)

    expected_channels = input_channels + num_convs * num_channels
    assert out.shape == (N, expected_channels, H, W), out.shape

    ref = jax.block_until_ready(dense_block_ref(X, params))
    np.testing.assert_allclose(np.asarray(out), np.asarray(ref), rtol=1e-3, atol=1e-3)

    print("KERNEL_OK")
</pallas_src>

<mosaic_0001>
module attributes {stable_mosaic.version = 11 : i64} {
  func.func @_dense_block_kernel(%arg0: memref<3x256xf32, #tpu.memory_space<vmem>>, %arg1: memref<9x256xf32, #tpu.memory_space<vmem>>, %arg2: memref<3x1xf32, #tpu.memory_space<vmem>>, %arg3: memref<3x1xf32, #tpu.memory_space<vmem>>, %arg4: memref<10x27xf32, #tpu.memory_space<vmem>>, %arg5: memref<10x1xf32, #tpu.memory_space<vmem>>, %arg6: memref<13x1xf32, #tpu.memory_space<vmem>>, %arg7: memref<13x1xf32, #tpu.memory_space<vmem>>, %arg8: memref<10x117xf32, #tpu.memory_space<vmem>>, %arg9: memref<10x1xf32, #tpu.memory_space<vmem>>, %arg10: memref<23x256xf32, #tpu.memory_space<vmem>>, %arg11: memref<117x256xf32, #tpu.memory_space<vmem>>) attributes {dimension_semantics = [], scalar_prefetch = 0 : i64, scratch_operands = 1 : i64, tpu.core_type = #tpu.core_type<tc>} {
    %c0 = arith.constant 0 : index
    %c0_0 = arith.constant 0 : index
    %0 = vector.load %arg0[%c0, %c0_0] : memref<3x256xf32, #tpu.memory_space<vmem>>, vector<3x256xf32>
    %c0_1 = arith.constant 0 : index
    %c0_2 = arith.constant 0 : index
    %1 = vector.load %arg10[%c0_1, %c0_2] : memref<23x256xf32, #tpu.memory_space<vmem>>, vector<3x256xf32>
    tpu.vector_store %arg10[%c0_1, %c0_2], %0 {strides = array<i32>} : memref<23x256xf32, #tpu.memory_space<vmem>>, vector<3x256xf32>,
    %c0_3 = arith.constant 0 : index
    %c0_4 = arith.constant 0 : index
    %2 = vector.load %arg10[%c0_3, %c0_4] : memref<23x256xf32, #tpu.memory_space<vmem>>, vector<3x256xf32>
    %cst = arith.constant dense<0.000000e+00> : vector<3xf32>
    %3 = vector.multi_reduction <add>, %2, %cst [1] : vector<3x256xf32> to vector<3xf32>
    %4 = vector.shape_cast %3 : vector<3xf32> to vector<3x1xf32>
    %cst_5 = arith.constant 2.560000e+02 : f32
    %5 = vector.broadcast %cst_5 : f32 to vector<3x1xf32>
    %6 = arith.divf %4, %5 : vector<3x1xf32>
    %7 = arith.mulf %2, %2 : vector<3x256xf32>
    %cst_6 = arith.constant dense<0.000000e+00> : vector<3xf32>
    %8 = vector.multi_reduction <add>, %7, %cst_6 [1] : vector<3x256xf32> to vector<3xf32>
    %9 = vector.shape_cast %8 : vector<3xf32> to vector<3x1xf32>
    %cst_7 = arith.constant 2.560000e+02 : f32
    %10 = vector.broadcast %cst_7 : f32 to vector<3x1xf32>
    %11 = arith.divf %9, %10 : vector<3x1xf32>
    %12 = arith.mulf %6, %6 : vector<3x1xf32>
    %13 = arith.subf %11, %12 : vector<3x1xf32>
    %cst_8 = arith.constant 9.99999974E-6 : f32
    %14 = vector.broadcast %cst_8 : f32 to vector<3x1xf32>
    %15 = arith.addf %13, %14 : vector<3x1xf32>
    %16 = math.rsqrt %15 : vector<3x1xf32>
    %17 = vector.broadcast %6 : vector<3x1xf32> to vector<3x256xf32>
    %18 = arith.subf %2, %17 : vector<3x256xf32>
    %c0_9 = arith.constant 0 : index
    %c0_10 = arith.constant 0 : index
    %19 = vector.load %arg2[%c0_9, %c0_10] : memref<3x1xf32, #tpu.memory_space<vmem>>, vector<3x1xf32>
    %20 = arith.mulf %16, %19 : vector<3x1xf32>
    %21 = vector.broadcast %20 : vector<3x1xf32> to vector<3x256xf32>
    %22 = arith.mulf %18, %21 : vector<3x256xf32>
    %c0_11 = arith.constant 0 : index
    %c0_12 = arith.constant 0 : index
    %23 = vector.load %arg3[%c0_11, %c0_12] : memref<3x1xf32, #tpu.memory_space<vmem>>, vector<3x1xf32>
    %24 = vector.broadcast %23 : vector<3x1xf32> to vector<3x256xf32>
    %25 = arith.addf %22, %24 : vector<3x256xf32>
    %cst_13 = arith.constant 0.000000e+00 : f32
    %26 = vector.broadcast %cst_13 : f32 to vector<3x256xf32>
    %27 = arith.maximumf %25, %26 : vector<3x256xf32>
    %c9_i32 = arith.constant 9 : i32
    %28 = tpu.dynamic_rotate %27 by %c9_i32 dim 1 : vector<3x256xf32>, i32 -> vector<3x256xf32>
    %c0_14 = arith.constant 0 : index
    %c0_15 = arith.constant 0 : index
    %29 = vector.load %arg1[%c0_14, %c0_15] : memref<9x256xf32, #tpu.memory_space<vmem>>, vector<1x256xf32>
    %30 = vector.broadcast %29 : vector<1x256xf32> to vector<3x256xf32>
    %31 = arith.mulf %28, %30 : vector<3x256xf32>
    %c0_16 = arith.constant 0 : index
    %c0_17 = arith.constant 0 : index
    %32 = vector.load %arg11[%c0_16, %c0_17] : memref<117x256xf32, #tpu.memory_space<vmem>>, vector<3x256xf32>
    tpu.vector_store %arg11[%c0_16, %c0_17], %31 {strides = array<i32>} : memref<117x256xf32, #tpu.memory_space<vmem>>, vector<3x256xf32>,
    %c8_i32 = arith.constant 8 : i32
    %33 = tpu.dynamic_rotate %27 by %c8_i32 dim 1 : vector<3x256xf32>, i32 -> vector<3x256xf32>
    %c1 = arith.constant 1 : index
    %c0_18 = arith.constant 0 : index
    %34 = vector.load %arg1[%c1, %c0_18] : memref<9x256xf32, #tpu.memory_space<vmem>>, vector<1x256xf32>
    %35 = vector.broadcast %34 : vector<1x256xf32> to vector<3x256xf32>
    %36 = arith.mulf %33, %35 : vector<3x256xf32>
    %c3 = arith.constant 3 : index
    %c0_19 = arith.constant 0 : index
    %37 = vector.load %arg11[%c3, %c0_19] : memref<117x256xf32, #tpu.memory_space<vmem>>, vector<3x256xf32>
    tpu.vector_store %arg11[%c3, %c0_19], %36 {strides = array<i32>} : memref<117x256xf32, #tpu.memory_space<vmem>>, vector<3x256xf32>,
    %c7_i32 = arith.constant 7 : i32
    %38 = tpu.dynamic_rotate %27 by %c7_i32 dim 1 : vector<3x256xf32>, i32 -> vector<3x256xf32>
    %c2 = arith.constant 2 : index
    %c0_20 = arith.constant 0 : index
    %39 = vector.load %arg1[%c2, %c0_20] : memref<9x256xf32, #tpu.memory_space<vmem>>, vector<1x256xf32>
    %40 = vector.broadcast %39 : vector<1x256xf32> to vector<3x256xf32>
    %41 = arith.mulf %38, %40 : vector<3x256xf32>
    %c6 = arith.constant 6 : index
    %c0_21 = arith.constant 0 : index
    %42 = vector.load %arg11[%c6, %c0_21] : memref<117x256xf32, #tpu.memory_space<vmem>>, vector<3x256xf32>
    tpu.vector_store %arg11[%c6, %c0_21], %41 {strides = array<i32>} : memref<117x256xf32, #tpu.memory_space<vmem>>, vector<3x256xf32>,
    %c1_i32 = arith.constant 1 : i32
    %43 = tpu.dynamic_rotate %27 by %c1_i32 dim 1 : vector<3x256xf32>, i32 -> vector<3x256xf32>
    %c3_22 = arith.constant 3 : index
    %c0_23 = arith.constant 0 : index
    %44 = vector.load %arg1[%c3_22, %c0_23] : memref<9x256xf32, #tpu.memory_space<vmem>>, vector<1x256xf32>
    %45 = vector.broadcast %44 : vector<1x256xf32> to vector<3x256xf32>
    %46 = arith.mulf %43, %45 : vector<3x256xf32>
    %c9 = arith.constant 9 : index
    %c0_24 = arith.constant 0 : index
    %47 = vector.load %arg11[%c9, %c0_24] : memref<117x256xf32, #tpu.memory_space<vmem>>, vector<3x256xf32>
    tpu.vector_store %arg11[%c9, %c0_24], %46 {strides = array<i32>} : memref<117x256xf32, #tpu.memory_space<vmem>>, vector<3x256xf32>,
    %c4 = arith.constant 4 : index
    %c0_25 = arith.constant 0 : index
    %48 = vector.load %arg1[%c4, %c0_25] : memref<9x256xf32, #tpu.memory_space<vmem>>, vector<1x256xf32>
    %49 = vector.broadcast %48 : vector<1x256xf32> to vector<3x256xf32>
    %50 = arith.mulf %27, %49 : vector<3x256xf32>
    %c12 = arith.constant 12 : index
    %c0_26 = arith.constant 0 : index
    %51 = vector.load %arg11[%c12, %c0_26] : memref<117x256xf32, #tpu.memory_space<vmem>>, vector<3x256xf32>
    tpu.vector_store %arg11[%c12, %c0_26], %50 {strides = array<i32>} : memref<117x256xf32, #tpu.memory_space<vmem>>, vector<3x256xf32>,
    %c255_i32 = arith.constant 255 : i32
    %52 = tpu.dynamic_rotate %27 by %c255_i32 dim 1 : vector<3x256xf32>, i32 -> vector<3x256xf32>
    %c5 = arith.constant 5 : index
    %c0_27 = arith.constant 0 : index
    %53 = vector.load %arg1[%c5, %c0_27] : memref<9x256xf32, #tpu.memory_space<vmem>>, vector<1x256xf32>
    %54 = vector.broadcast %53 : vector<1x256xf32> to vector<3x256xf32>
    %55 = arith.mulf %52, %54 : vector<3x256xf32>
    %c15 = arith.constant 15 : index
    %c0_28 = arith.constant 0 : index
    %56 = vector.load %arg11[%c15, %c0_28] : memref<117x256xf32, #tpu.memory_space<vmem>>, vector<3x256xf32>
    tpu.vector_store %arg11[%c15, %c0_28], %55 {strides = array<i32>} : memref<117x256xf32, #tpu.memory_space<vmem>>, vector<3x256xf32>,
    %c249_i32 = arith.constant 249 : i32
    %57 = tpu.dynamic_rotate %27 by %c249_i32 dim 1 : vector<3x256xf32>, i32 -> vector<3x256xf32>
    %c6_29 = arith.constant 6 : index
    %c0_30 = arith.constant 0 : index
    %58 = vector.load %arg1[%c6_29, %c0_30] : memref<9x256xf32, #tpu.memory_space<vmem>>, vector<1x256xf32>
    %59 = vector.broadcast %58 : vector<1x256xf32> to vector<3x256xf32>
    %60 = arith.mulf %57, %59 : vector<3x256xf32>
    %c18 = arith.constant 18 : index
    %c0_31 = arith.constant 0 : index
    %61 = vector.load %arg11[%c18, %c0_31] : memref<117x256xf32, #tpu.memory_space<vmem>>, vector<3x256xf32>
    tpu.vector_store %arg11[%c18, %c0_31], %60 {strides = array<i32>} : memref<117x256xf32, #tpu.memory_space<vmem>>, vector<3x256xf32>,
    %c248_i32 = arith.constant 248 : i32
    %62 = tpu.dynamic_rotate %27 by %c248_i32 dim 1 : vector<3x256xf32>, i32 -> vector<3x256xf32>
    %c7 = arith.constant 7 : index
    %c0_32 = arith.constant 0 : index
    %63 = vector.load %arg1[%c7, %c0_32] : memref<9x256xf32, #tpu.memory_space<vmem>>, vector<1x256xf32>
    %64 = vector.broadcast %63 : vector<1x256xf32> to vector<3x256xf32>
    %65 = arith.mulf %62, %64 : vector<3x256xf32>
    %c21 = arith.constant 21 : index
    %c0_33 = arith.constant 0 : index
    %66 = vector.load %arg11[%c21, %c0_33] : memref<117x256xf32, #tpu.memory_space<vmem>>, vector<3x256xf32>
    tpu.vector_store %arg11[%c21, %c0_33], %65 {strides = array<i32>} : memref<117x256xf32, #tpu.memory_space<vmem>>, vector<3x256xf32>,
    %c247_i32 = arith.constant 247 : i32
    %67 = tpu.dynamic_rotate %27 by %c247_i32 dim 1 : vector<3x256xf32>, i32 -> vector<3x256xf32>
    %c8 = arith.constant 8 : index
    %c0_34 = arith.constant 0 : index
    %68 = vector.load %arg1[%c8, %c0_34] : memref<9x256xf32, #tpu.memory_space<vmem>>, vector<1x256xf32>
    %69 = vector.broadcast %68 : vector<1x256xf32> to vector<3x256xf32>
    %70 = arith.mulf %67, %69 : vector<3x256xf32>
    %c24 = arith.constant 24 : index
    %c0_35 = arith.constant 0 : index
    %71 = vector.load %arg11[%c24, %c0_35] : memref<117x256xf32, #tpu.memory_space<vmem>>, vector<3x256xf32>
    tpu.vector_store %arg11[%c24, %c0_35], %70 {strides = array<i32>} : memref<117x256xf32, #tpu.memory_space<vmem>>, vector<3x256xf32>,
    %c0_36 = arith.constant 0 : index
    %c0_37 = arith.constant 0 : index
    %72 = vector.load %arg4[%c0_36, %c0_37] : memref<10x27xf32, #tpu.memory_space<vmem>>, vector<10x27xf32>
    %c0_38 = arith.constant 0 : index
    %c0_39 = arith.constant 0 : index
    %73 = vector.load %arg11[%c0_38, %c0_39] : memref<117x256xf32, #tpu.memory_space<vmem>>, vector<27x256xf32>
    %cst_40 = arith.constant dense<0.000000e+00> : vector<10x256xf32>
    %74 = tpu.matmul %72, %73, %cst_40 {dimension_numbers = #tpu.dot_dimension_numbers<[1], [0], [0], [1], [0, 0, 1, 1], [], []>} : vector<10x27xf32>, vector<27x256xf32>, vector<10x256xf32> -> vector<10x256xf32>
    %c0_41 = arith.constant 0 : index
    %c0_42 = arith.constant 0 : index
    %75 = vector.load %arg5[%c0_41, %c0_42] : memref<10x1xf32, #tpu.memory_space<vmem>>, vector<10x1xf32>
    %76 = vector.broadcast %75 : vector<10x1xf32> to vector<10x256xf32>
    %77 = arith.addf %74, %76 : vector<10x256xf32>
    %c3_43 = arith.constant 3 : index
    %c0_44 = arith.constant 0 : index
    %78 = vector.load %arg10[%c3_43, %c0_44] : memref<23x256xf32, #tpu.memory_space<vmem>>, vector<10x256xf32>
    tpu.vector_store %arg10[%c3_43, %c0_44], %77 {strides = array<i32>} : memref<23x256xf32, #tpu.memory_space<vmem>>, vector<10x256xf32>,
    %c0_45 = arith.constant 0 : index
    %c0_46 = arith.constant 0 : index
    %79 = vector.load %arg10[%c0_45, %c0_46] : memref<23x256xf32, #tpu.memory_space<vmem>>, vector<13x256xf32>
    %cst_47 = arith.constant dense<0.000000e+00> : vector<13xf32>
    %80 = vector.multi_reduction <add>, %79, %cst_47 [1] : vector<13x256xf32> to vector<13xf32>
    %81 = vector.shape_cast %80 : vector<13xf32> to vector<13x1xf32>
    %cst_48 = arith.constant 2.560000e+02 : f32
    %82 = vector.broadcast %cst_48 : f32 to vector<13x1xf32>
    %83 = arith.divf %81, %82 : vector<13x1xf32>
    %84 = arith.mulf %79, %79 : vector<13x256xf32>
    %cst_49 = arith.constant dense<0.000000e+00> : vector<13xf32>
    %85 = vector.multi_reduction <add>, %84, %cst_49 [1] : vector<13x256xf32> to vector<13xf32>
    %86 = vector.shape_cast %85 : vector<13xf32> to vector<13x1xf32>
    %cst_50 = arith.constant 2.560000e+02 : f32
    %87 = vector.broadcast %cst_50 : f32 to vector<13x1xf32>
    %88 = arith.divf %86, %87 : vector<13x1xf32>
    %89 = arith.mulf %83, %83 : vector<13x1xf32>
    %90 = arith.subf %88, %89 : vector<13x1xf32>
    %cst_51 = arith.constant 9.99999974E-6 : f32
    %91 = vector.broadcast %cst_51 : f32 to vector<13x1xf32>
    %92 = arith.addf %90, %91 : vector<13x1xf32>
    %93 = math.rsqrt %92 : vector<13x1xf32>
    %94 = vector.broadcast %83 : vector<13x1xf32> to vector<13x256xf32>
    %95 = arith.subf %79, %94 : vector<13x256xf32>
    %c0_52 = arith.constant 0 : index
    %c0_53 = arith.constant 0 : index
    %96 = vector.load %arg6[%c0_52, %c0_53] : memref<13x1xf32, #tpu.memory_space<vmem>>, vector<13x1xf32>
    %97 = arith.mulf %93, %96 : vector<13x1xf32>
    %98 = vector.broadcast %97 : vector<13x1xf32> to vector<13x256xf32>
    %99 = arith.mulf %95, %98 : vector<13x256xf32>
    %c0_54 = arith.constant 0 : index
    %c0_55 = arith.constant 0 : index
    %100 = vector.load %arg7[%c0_54, %c0_55] : memref<13x1xf32, #tpu.memory_space<vmem>>, vector<13x1xf32>
    %101 = vector.broadcast %100 : vector<13x1xf32> to vector<13x256xf32>
    %102 = arith.addf %99, %101 : vector<13x256xf32>
    %cst_56 = arith.constant 0.000000e+00 : f32
    %103 = vector.broadcast %cst_56 : f32 to vector<13x256xf32>
    %104 = arith.maximumf %102, %103 : vector<13x256xf32>
    %c9_i32_57 = arith.constant 9 : i32
    %105 = tpu.dynamic_rotate %104 by %c9_i32_57 dim 1 : vector<13x256xf32>, i32 -> vector<13x256xf32>
    %c0_58 = arith.constant 0 : index
    %c0_59 = arith.constant 0 : index
    %106 = vector.load %arg1[%c0_58, %c0_59] : memref<9x256xf32, #tpu.memory_space<vmem>>, vector<1x256xf32>
    %107 = vector.broadcast %106 : vector<1x256xf32> to vector<13x256xf32>
    %108 = arith.mulf %105, %107 : vector<13x256xf32>
    %c0_60 = arith.constant 0 : index
    %c0_61 = arith.constant 0 : index
    %109 = vector.load %arg11[%c0_60, %c0_61] : memref<117x256xf32, #tpu.memory_space<vmem>>, vector<13x256xf32>
    tpu.vector_store %arg11[%c0_60, %c0_61], %108 {strides = array<i32>} : memref<117x256xf32, #tpu.memory_space<vmem>>, vector<13x256xf32>,
    %c8_i32_62 = arith.constant 8 : i32
    %110 = tpu.dynamic_rotate %104 by %c8_i32_62 dim 1 : vector<13x256xf32>, i32 -> vector<13x256xf32>
    %c1_63 = arith.constant 1 : index
    %c0_64 = arith.constant 0 : index
    %111 = vector.load %arg1[%c1_63, %c0_64] : memref<9x256xf32, #tpu.memory_space<vmem>>, vector<1x256xf32>
    %112 = vector.broadcast %111 : vector<1x256xf32> to vector<13x256xf32>
    %113 = arith.mulf %110, %112 : vector<13x256xf32>
    %c13 = arith.constant 13 : index
    %c0_65 = arith.constant 0 : index
    %114 = vector.load %arg11[%c13, %c0_65] : memref<117x256xf32, #tpu.memory_space<vmem>>, vector<13x256xf32>
    tpu.vector_store %arg11[%c13, %c0_65], %113 {strides = array<i32>} : memref<117x256xf32, #tpu.memory_space<vmem>>, vector<13x256xf32>,
    %c7_i32_66 = arith.constant 7 : i32
    %115 = tpu.dynamic_rotate %104 by %c7_i32_66 dim 1 : vector<13x256xf32>, i32 -> vector<13x256xf32>
    %c2_67 = arith.constant 2 : index
    %c0_68 = arith.constant 0 : index
    %116 = vector.load %arg1[%c2_67, %c0_68] : memref<9x256xf32, #tpu.memory_space<vmem>>, vector<1x256xf32>
    %117 = vector.broadcast %116 : vector<1x256xf32> to vector<13x256xf32>
    %118 = arith.mulf %115, %117 : vector<13x256xf32>
    %c26 = arith.constant 26 : index
    %c0_69 = arith.constant 0 : index
    %119 = vector.load %arg11[%c26, %c0_69] : memref<117x256xf32, #tpu.memory_space<vmem>>, vector<13x256xf32>
    tpu.vector_store %arg11[%c26, %c0_69], %118 {strides = array<i32>} : memref<117x256xf32, #tpu.memory_space<vmem>>, vector<13x256xf32>,
    %c1_i32_70 = arith.constant 1 : i32
    %120 = tpu.dynamic_rotate %104 by %c1_i32_70 dim 1 : vector<13x256xf32>, i32 -> vector<13x256xf32>
    %c3_71 = arith.constant 3 : index
    %c0_72 = arith.constant 0 : index
    %121 = vector.load %arg1[%c3_71, %c0_72] : memref<9x256xf32, #tpu.memory_space<vmem>>, vector<1x256xf32>
    %122 = vector.broadcast %121 : vector<1x256xf32> to vector<13x256xf32>
    %123 = arith.mulf %120, %122 : vector<13x256xf32>
    %c39 = arith.constant 39 : index
    %c0_73 = arith.constant 0 : index
    %124 = vector.load %arg11[%c39, %c0_73] : memref<117x256xf32, #tpu.memory_space<vmem>>, vector<13x256xf32>
    tpu.vector_store %arg11[%c39, %c0_73], %123 {strides = array<i32>} : memref<117x256xf32, #tpu.memory_space<vmem>>, vector<13x256xf32>,
    %c4_74 = arith.constant 4 : index
    %c0_75 = arith.constant 0 : index
    %125 = vector.load %arg1[%c4_74, %c0_75] : memref<9x256xf32, #tpu.memory_space<vmem>>, vector<1x256xf32>
    %126 = vector.broadcast %125 : vector<1x256xf32> to vector<13x256xf32>
    %127 = arith.mulf %104, %126 : vector<13x256xf32>
    %c52 = arith.constant 52 : index
    %c0_76 = arith.constant 0 : index
    %128 = vector.load %arg11[%c52, %c0_76] : memref<117x256xf32, #tpu.memory_space<vmem>>, vector<13x256xf32>
    tpu.vector_store %arg11[%c52, %c0_76], %127 {strides = array<i32>} : memref<117x256xf32, #tpu.memory_space<vmem>>, vector<13x256xf32>,
    %c255_i32_77 = arith.constant 255 : i32
    %129 = tpu.dynamic_rotate %104 by %c255_i32_77 dim 1 : vector<13x256xf32>, i32 -> vector<13x256xf32>
    %c5_78 = arith.constant 5 : index
    %c0_79 = arith.constant 0 : index
    %130 = vector.load %arg1[%c5_78, %c0_79] : memref<9x256xf32, #tpu.memory_space<vmem>>, vector<1x256xf32>
    %131 = vector.broadcast %130 : vector<1x256xf32> to vector<13x256xf32>
    %132 = arith.mulf %129, %131 : vector<13x256xf32>
    %c65 = arith.constant 65 : index
    %c0_80 = arith.constant 0 : index
    %133 = vector.load %arg11[%c65, %c0_80] : memref<117x256xf32, #tpu.memory_space<vmem>>, vector<13x256xf32>
    tpu.vector_store %arg11[%c65, %c0_80], %132 {strides = array<i32>} : memref<117x256xf32, #tpu.memory_space<vmem>>, vector<13x256xf32>,
    %c249_i32_81 = arith.constant 249 : i32
    %134 = tpu.dynamic_rotate %104 by %c249_i32_81 dim 1 : vector<13x256xf32>, i32 -> vector<13x256xf32>
    %c6_82 = arith.constant 6 : index
    %c0_83 = arith.constant 0 : index
    %135 = vector.load %arg1[%c6_82, %c0_83] : memref<9x256xf32, #tpu.memory_space<vmem>>, vector<1x256xf32>
    %136 = vector.broadcast %135 : vector<1x256xf32> to vector<13x256xf32>
    %137 = arith.mulf %134, %136 : vector<13x256xf32>
    %c78 = arith.constant 78 : index
    %c0_84 = arith.constant 0 : index
    %138 = vector.load %arg11[%c78, %c0_84] : memref<117x256xf32, #tpu.memory_space<vmem>>, vector<13x256xf32>
    tpu.vector_store %arg11[%c78, %c0_84], %137 {strides = array<i32>} : memref<117x256xf32, #tpu.memory_space<vmem>>, vector<13x256xf32>,
    %c248_i32_85 = arith.constant 248 : i32
    %139 = tpu.dynamic_rotate %104 by %c248_i32_85 dim 1 : vector<13x256xf32>, i32 -> vector<13x256xf32>
    %c7_86 = arith.constant 7 : index
    %c0_87 = arith.constant 0 : index
    %140 = vector.load %arg1[%c7_86, %c0_87] : memref<9x256xf32, #tpu.memory_space<vmem>>, vector<1x256xf32>
    %141 = vector.broadcast %140 : vector<1x256xf32> to vector<13x256xf32>
    %142 = arith.mulf %139, %141 : vector<13x256xf32>
    %c91 = arith.constant 91 : index
    %c0_88 = arith.constant 0 : index
    %143 = vector.load %arg11[%c91, %c0_88] : memref<117x256xf32, #tpu.memory_space<vmem>>, vector<13x256xf32>
    tpu.vector_store %arg11[%c91, %c0_88], %142 {strides = array<i32>} : memref<117x256xf32, #tpu.memory_space<vmem>>, vector<13x256xf32>,
    %c247_i32_89 = arith.constant 247 : i32
    %144 = tpu.dynamic_rotate %104 by %c247_i32_89 dim 1 : vector<13x256xf32>, i32 -> vector<13x256xf32>
    %c8_90 = arith.constant 8 : index
    %c0_91 = arith.constant 0 : index
    %145 = vector.load %arg1[%c8_90, %c0_91] : memref<9x256xf32, #tpu.memory_space<vmem>>, vector<1x256xf32>
    %146 = vector.broadcast %145 : vector<1x256xf32> to vector<13x256xf32>
    %147 = arith.mulf %144, %146 : vector<13x256xf32>
    %c104 = arith.constant 104 : index
    %c0_92 = arith.constant 0 : index
    %148 = vector.load %arg11[%c104, %c0_92] : memref<117x256xf32, #tpu.memory_space<vmem>>, vector<13x256xf32>
    tpu.vector_store %arg11[%c104, %c0_92], %147 {strides = array<i32>} : memref<117x256xf32, #tpu.memory_space<vmem>>, vector<13x256xf32>,
    %c0_93 = arith.constant 0 : index
    %c0_94 = arith.constant 0 : index
    %149 = vector.load %arg8[%c0_93, %c0_94] : memref<10x117xf32, #tpu.memory_space<vmem>>, vector<10x117xf32>
    %c0_95 = arith.constant 0 : index
    %c0_96 = arith.constant 0 : index
    %150 = vector.load %arg11[%c0_95, %c0_96] : memref<117x256xf32, #tpu.memory_space<vmem>>, vector<117x256xf32>
    %cst_97 = arith.constant dense<0.000000e+00> : vector<10x256xf32>
    %151 = tpu.matmul %149, %150, %cst_97 {dimension_numbers = #tpu.dot_dimension_numbers<[1], [0], [0], [1], [0, 0, 1, 1], [], []>} : vector<10x117xf32>, vector<117x256xf32>, vector<10x256xf32> -> vector<10x256xf32>
    %c0_98 = arith.constant 0 : index
    %c0_99 = arith.constant 0 : index
    %152 = vector.load %arg9[%c0_98, %c0_99] : memref<10x1xf32, #tpu.memory_space<vmem>>, vector<10x1xf32>
    %153 = vector.broadcast %152 : vector<10x1xf32> to vector<10x256xf32>
    %154 = arith.addf %151, %153 : vector<10x256xf32>
    %c13_100 = arith.constant 13 : index
    %c0_101 = arith.constant 0 : index
    %155 = vector.load %arg10[%c13_100, %c0_101] : memref<23x256xf32, #tpu.memory_space<vmem>>, vector<10x256xf32>
    tpu.vector_store %arg10[%c13_100, %c0_101], %154 {strides = array<i32>} : memref<23x256xf32, #tpu.memory_space<vmem>>, vector<10x256xf32>,
    return
  }
}

</mosaic_0001>

<bundles_post_ra>
// kernel: tpu_custom_call.1
= control target key start
LH: loop header
LB: loop body
LE: loop exit
PB: predicated region body
PF: predicated region fallthrough
CT: control target
= control target key end

     0   :  { %s1741_s0 = inlined_call_operand.vmem [shape: f32[3,256], index: 0, kind: input, shape index: {}]   ;;  %s1742_s1 = inlined_call_operand.vmem [shape: f32[9,256], index: 1, kind: input, shape index: {}]   ;;  %s1743_s2 = inlined_call_operand.vmem [shape: f32[3,1], index: 2, kind: input, shape index: {}]   ;;  %s1744_s3 = inlined_call_operand.vmem [shape: f32[3,1], index: 3, kind: input, shape index: {}]   ;;  %s1745_s4 = inlined_call_operand.vmem [shape: f32[10,27], index: 4, kind: input, shape index: {}]   ;;  %s1746_s5 = inlined_call_operand.vmem [shape: f32[10,1], index: 5, kind: input, shape index: {}]   ;;  %s1747_s6 = inlined_call_operand.vmem [shape: f32[13,1], index: 6, kind: input, shape index: {}]   ;;  %s1748_s7 = inlined_call_operand.vmem [shape: f32[13,1], index: 7, kind: input, shape index: {}]   ;;  %s1749_s8 = inlined_call_operand.vmem [shape: f32[10,117], index: 8, kind: input, shape index: {}]   ;;  %s1750_s9 = inlined_call_operand.vmem [shape: f32[10,1], index: 9, kind: input, shape index: {}]   ;;  %s1751_s10 = inlined_call_operand.hbm [shape: f32[23,256], index: 10, kind: output, shape index: {}]  }
   0x1   :  { %v36_v0 = vld [vmem:[%s1741_s0] sm:$0x77] }
   0x2   :  { %15 = vsyncpa [#allocation4], 0  ;;  %v38_v1 = vcombine.high %v36_v0, %v36_v0  ;;  %40 = vst [vmem:[#allocation3] sm:$0x7] %v36_v0  ;;  %vm44_vm0 = vcmask 1042432   ;;  %v1222_v12 = vmov 0   ;;  %v89_v24 = vlaneseq }
   0x3   :  { %1189 = vset.pattern.permute.xlu1 %v1222_v12  ;;  %1190 = vset.pattern.permute.xlu0 %v1222_v12  ;;  %v66_v20 = vld [vmem:[%s1743_s2] sm:$0x7]  ;;  %v1116_v31 = vld [vmem:[%s1742_s1 + $0x4] ss:$8 sm:$0x3]  ;;  %s1223_s2 = smov 8  }
   0x4   :  { %41 = vst [vmem:[#allocation3 + $0x8] sm:$0x7] %v38_v1  ;;  %v75_v23 = vld [vmem:[%s1744_s3] sm:$0x7]  ;;  %v97_v25 = vshrl.u32 %v89_v24, 7  ;;  %s1224_s3 = smov 7  }
   0x5   :  { %s1225_s20 = smov 127   ;;  %s1226_s21 = smov 9   ;;  %v351_v45 = vld [vmem:[%s1746_s5] sm:$0xff]  ;;  %v1231_v46 = vmov 0.0   ;;  %v352_v47 = vld [vmem:[%s1746_s5 + $0x8] sm:$0x3] }
   0x6   :  { %v1304_v29 = vsub.s32 0, %v97_v25  ;;  %v1306_v30 = vsub.s32 1, %v97_v25  ;;  %s1227_s22 = smov 1   ;;  %s1228_s23 = smov 121   ;;  %440 = vmatprep.mubr.f32.mxu0 %v1231_v46  ;;  %1066 = vmatprep.mubr.f32.mxu1 %v1231_v46  ;;  %v1337_v48 = vand.u32 127, %v89_v24  ;;  %vm1232_vm9 = vmmov 1  }
   0x7   :  { %s1229_s24 = smov 120   ;;  %s1230_s25 = smov 119   ;;  %v1113_v49 = vld [vmem:[%s1742_s1 + $0x1] ss:$8 sm:$0x3]  ;;  %vm1142_vm10 = vmpackc.low %vm44_vm0, %vm1232_vm9  ;;  %vm363_vm11 = vcmask 220160  }
   0x8   :  { %v212_v37 = vrot.slane %v1116_v31, %v1306_v30  ;;  %v208_v38 = vrot.slane %v1116_v31, %v1304_v29  ;;  %vm114_vm1 = vcmp.lt.s32.totalorder %v1337_v48, 8  ;;  %v123_v50 = vrot.slane %v1113_v49, %v1304_v29  ;;  %v1114_v58 = vld [vmem:[%s1742_s1 + $0x2] ss:$8 sm:$0x3]  ;;  %s1233_s16 = smov [#allocation3]  }
   0x9   :  { %v42_v2 = vld [vmem:[#allocation3] sm:$0x7]  ;;  %v127_v51 = vrot.slane %v1113_v49, %v1306_v30  ;;  %vm144_vm2 = vcmp.lt.s32.totalorder %v1337_v48, 7  ;;  %v153_v62 = vrot.slane %v1114_v58, %v1304_v29  ;;  %v157_v63 = vrot.slane %v1114_v58, %v1306_v30  ;;  %v1117_v12 = vld [vmem:[%s1742_s1 + $0x5] ss:$8 sm:$0x3] }
   0xa   :  { %v45_v3 = vsel %vm44_vm0, %v42_v2, 0.0  ;;  %v52_v4 = vmul.f32 %v42_v2, %v42_v2  ;;  %vm176_vm3 = vcmp.lt.s32.totalorder %v1337_v48, 1  ;;  %vm229_vm4 = vcmp.lt.s32.totalorder %v1337_v48, 127  ;;  %s1102_s17 = sshll.u32 %s1233_s16, 4  ;;  %s1103_s17 = int_to_ptr.vmem [resolvable:$true] %s1102_s17 }
   0xb   :  { %v43_v5 = vld [vmem:[#allocation3 + $0x8] sm:$0x7]  ;;  %vm91_vm5 = vcmp.lt.s32.totalorder %v1337_v48, 9  ;;  %vm261_vm6 = vcmp.lt.s32.totalorder %v1337_v48, 121  ;;  %vm291_vm7 = vcmp.lt.s32.totalorder %v1337_v48, 120  ;;  %vm321_vm8 = vcmp.lt.s32.totalorder %v1337_v48, 119  ;;  %p1203_p1 = scmp.lt.s32.totalorder %s1103_s17, %s1103_s17 }
   0xc   :  { %v46_v6 = vsel %vm44_vm0, %v43_v5, 0.0  ;;  %v53_v7 = vmul.f32 %v43_v5, %v43_v5  ;;  %v54_v8 = vsel %vm44_vm0, %v52_v4, 0.0  ;;  %vm478_vm12 = vcmask 1044480   ;;  %v945_v48 = vld [vmem:[%s1749_s8] sm:$0xff] }
   0xd   :  { %v47_v9 = vadd.f32 %v46_v6, %v45_v3  ;;  %vm750_vm13 = vcmask 1043456   ;;  %vm711_vm14 = vcmask 1046528   ;;  %vm664_vm15 = vcmask 1041408  }
   0xe   :  { %v55_v10 = vsel %vm44_vm0, %v53_v7, 0.0 }
   0xf   :  { %48 = vadd.xlane.f32.xlu0 %v47_v9  ;;  %v56_v11 = vadd.f32 %v55_v10, %v54_v8 }
  0x13   :  { %57 = vadd.xlane.f32.xlu0 %v56_v11 }
  0x9c   :  { %v49_v13 = vpop.xlane.xlu0 %48 }
  0x9d   :  { %v51_v14 = vmul.f32 0.00390625, %v49_v13 }
  0x9f   :  { %v60_v16 = vmul.f32 %v51_v14, %v51_v14  ;;  %v64_v27 = vsub.f32 %v42_v2, %v51_v14  ;;  %v65_v28 = vsub.f32 %v43_v5, %v51_v14  ;;  %v1115_v5 = vld [vmem:[%s1742_s1 + $0x3] ss:$8 sm:$0x3] }
  0xa0   :  { %v58_v15 = vpop.xlane.xlu0 %57  ;;  %v185_v10 = vrot.slane %v1115_v5, %v1304_v29  ;;  %v189_v11 = vrot.slane %v1115_v5, %v1306_v30 }
  0xa1   :  { %v59_v17 = vmul.f32 0.00390625, %v58_v15 }
  0xa3   :  { %v61_v18 = vsub.f32 %v59_v17, %v60_v16 }
  0xa5   :  { %v62_v19 = vadd.f32 1e-05, %v61_v18 }
  0xa7   :  { %1192 = vrsqrt.f32 %v62_v19  ;;  %v238_v19 = vrot.slane %v1117_v12, %v1304_v29 }
  0xb1   :  { %v1193_v21 = vpop.eup %1192 }
  0xb2   :  { %v67_v22 = vmul.f32 %v1193_v21, %v66_v20  ;;  %v242_v20 = vrot.slane %v1117_v12, %v1306_v30  ;;  %v94_v21 = vld [vmem:[%s1742_s1] ss:$8 sm:$0x3] }
  0xb3   :  { %v99_v31 = vrot.slane %v94_v21, %v1304_v29 }
  0xb4   :  { %70 = vperm.xlu1 %1189, %v67_v22  }
  0xb8   :  { %78 = vperm.xlu1 %1189, %v75_v23  }
 0x133   :  { %v71_v26 = vpop.permute.xlu1 %70 }
 0x134   :  { %v73_v32 = vmul.f32 %v71_v26, %v64_v27  ;;  %v74_v33 = vmul.f32 %v71_v26, %v65_v28 }
 0x137   :  { %v79_v34 = vpop.permute.xlu1 %78 }
 0x138   :  { %v81_v35 = vadd.f32 %v79_v34, %v73_v32  ;;  %v82_v36 = vadd.f32 %v79_v34, %v74_v33  ;;  %v103_v32 = vrot.slane %v94_v21, %v1306_v30  ;;  %v1118_v33 = vld [vmem:[%s1742_s1 + $0x6] ss:$8 sm:$0x3] }
 0x139   :  { %v341_v21 = vld [vmem:[%s1745_s4] sm:$0xff] }
 0x13a   :  { %v83_v39 = vmax.f32 %v81_v35, 0.0  ;;  %v84_v40 = vmax.f32 %v82_v36, 0.0 }
 0x13c   :  { %112 = vrot.lane.b32.xlu1 %v84_v40, %s1223_s2  ;;  %110 = vrot.lane.b32.xlu0 %v83_v39, %s1223_s2  ;;  %v216_v41 = vmul.f32 %v212_v37, %v84_v40  ;;  %v215_v42 = vmul.f32 %v208_v38, %v83_v39 }
 0x13e   :  { %v220_v43 = vrot.slane %v216_v41, 4  ;;  %v219_v44 = vrot.slane %v215_v42, 4  ;;  %v270_v42 = vrot.slane %v1118_v33, %v1304_v29 }
 0x140   :  { %140 = vrot.lane.b32.xlu1 %v83_v39, %s1224_s3  ;;  %227 = vrot.lane.b32.xlu0 %v84_v40, %s1225_s20  ;;  %224 = vst [vmem:[#allocation2 + $0x18] sm:$0x70] %v220_v43  ;;  %223 = vst [vmem:[#allocation2 + $0x10] sm:$0x70] %v219_v44  ;;  %v274_v43 = vrot.slane %v1118_v33, %v1306_v30 }
 0x141   :  { %v1119_v44 = vld [vmem:[%s1742_s1 + $0x7] ss:$8 sm:$0x3] }
 0x144   :  { %142 = vrot.lane.b32.xlu1 %v84_v40, %s1224_s3  ;;  %87 = vrot.lane.b32.xlu0 %v84_v40, %s1226_s21 }
 0x148   :  { %172 = vrot.lane.b32.xlu1 %v83_v39, %s1227_s22  ;;  %259 = vrot.lane.b32.xlu0 %v84_v40, %s1228_s23 }
 0x14c   :  { %174 = vrot.lane.b32.xlu1 %v84_v40, %s1227_s22  ;;  %289 = vrot.lane.b32.xlu0 %v84_v40, %s1229_s24 }
 0x150   :  { %225 = vrot.lane.b32.xlu1 %v83_v39, %s1225_s20  ;;  %319 = vrot.lane.b32.xlu0 %v84_v40, %s1230_s25 }
 0x154   :  { %85 = vrot.lane.b32.xlu1 %v83_v39, %s1226_s21  ;;  %360 = vperm.xlu0 %1190, %v352_v47  }
 0x158   :  { %257 = vrot.lane.b32.xlu1 %v83_v39, %s1228_s23 }
 0x15c   :  { %287 = vrot.lane.b32.xlu1 %v83_v39, %s1229_s24 }
 0x160   :  { %317 = vrot.lane.b32.xlu1 %v83_v39, %s1230_s25 }
 0x164   :  { %355 = vperm.xlu1 %1189, %v351_v45  }
 0x1ae   :  { %v113_v52 = vpop.permute.xlu1 %112  ;;  %v111_v53 = vpop.permute.xlu0 %110 }
 0x1af   :  { %v115_v54 = vsel %vm114_vm1, %v111_v53, %v113_v52  ;;  %v116_v55 = vsel %vm114_vm1, %v113_v52, %v111_v53  ;;  %v300_v53 = vrot.slane %v1119_v44, %v1304_v29 }
 0x1b0   :  { %v130_v56 = vmul.f32 %v123_v50, %v116_v55  ;;  %v131_v57 = vmul.f32 %v127_v51, %v115_v54  ;;  %v304_v54 = vrot.slane %v1119_v44, %v1306_v30  ;;  %v1120_v55 = vld [vmem:[%s1742_s1 + $0x10] ss:$8 sm:$0x3] }
 0x1b2   :  { %v134_v59 = vrot.slane %v130_v56, 5  ;;  %v135_v60 = vrot.slane %v131_v57, 5  ;;  %v141_v61 = vpop.permute.xlu1 %140  ;;  %v228_v6 = vpop.permute.xlu0 %227 }
 0x1b4   :  { %138 = vst [vmem:[#allocation2] sm:$0x38] %v134_v59  ;;  %139 = vst [vmem:[#allocation2 + $0x8] sm:$0x38] %v135_v60 }
 0x1b6   :  { %v143_v0 = vpop.permute.xlu1 %142  ;;  %v88_v16 = vpop.permute.xlu0 %87 }
 0x1b7   :  { %v145_v1 = vsel %vm144_vm2, %v141_v61, %v143_v0  ;;  %v146_v2 = vsel %vm144_vm2, %v143_v0, %v141_v61  ;;  %v334_v0 = vrot.slane %v1120_v55, %v1306_v30 }
 0x1b8   :  { %v160_v3 = vmul.f32 %v153_v62, %v146_v2  ;;  %v161_v4 = vmul.f32 %v157_v63, %v145_v1  ;;  %v330_v63 = vrot.slane %v1120_v55, %v1304_v29 }
 0x1ba   :  { %v164_v7 = vrot.slane %v160_v3, 2  ;;  %v165_v8 = vrot.slane %v161_v4, 2  ;;  %v173_v9 = vpop.permute.xlu1 %172  ;;  %v260_v34 = vpop.permute.xlu0 %259 }
 0x1bc   :  { %168 = vst [vmem:[#allocation2 + $0x10] ss:$-12 sps:$4 sm:$0xc1] %v164_v7   ;;  %169 = vst [vmem:[#allocation2 + $0x18] ss:$-12 sps:$4 sm:$0xc1] %v165_v8  }
 0x1be   :  { %v175_v13 = vpop.permute.xlu1 %174  ;;  %v290_v50 = vpop.permute.xlu0 %289 }
 0x1bf   :  { %v177_v14 = vsel %vm176_vm3, %v173_v9, %v175_v13  ;;  %v178_v15 = vsel %vm176_vm3, %v175_v13, %v173_v9 }
 0x1c0   :  { %v192_v17 = vmul.f32 %v185_v10, %v178_v15  ;;  %v193_v18 = vmul.f32 %v189_v11, %v177_v14 }
 0x1c2   :  { %v196_v22 = vrot.slane %v192_v17, 7  ;;  %v197_v23 = vrot.slane %v193_v18, 7  ;;  %v226_v24 = vpop.permute.xlu1 %225  ;;  %v320_v5 = vpop.permute.xlu0 %319 }
 0x1c3   :  { %v230_v25 = vsel %vm229_vm4, %v226_v24, %v228_v6  ;;  %v231_v26 = vsel %vm229_vm4, %v228_v6, %v226_v24 }
 0x1c4   :  { %200 = vst [vmem:[#allocation2 + $0x10] sm:$0xe] %v196_v22  ;;  %201 = vst [vmem:[#allocation2 + $0x18] sm:$0xe] %v197_v23  ;;  %v245_v27 = vmul.f32 %v238_v19, %v230_v25  ;;  %v246_v28 = vmul.f32 %v242_v20, %v231_v26  ;;  %v342_v22 = vld [vmem:[%s1745_s4 + $0x8] sm:$0x3] }
 0x1c6   :  { %v249_v35 = vrot.slane %v245_v27, 1  ;;  %v250_v36 = vrot.slane %v246_v28, 1  ;;  %v86_v37 = vpop.permute.xlu1 %85 }
 0x1c7   :  { %v92_v38 = vsel %vm91_vm5, %v86_v37, %v88_v16  ;;  %v93_v39 = vsel %vm91_vm5, %v88_v16, %v86_v37 }
 0x1c8   :  { %253 = vst [vmem:[#allocation2 + $0x20] ss:$-12 sps:$4 sm:$0x83] %v249_v35   ;;  %254 = vst [vmem:[#allocation2 + $0x28] ss:$-12 sps:$4 sm:$0x83] %v250_v36   ;;  %v106_v40 = vmul.f32 %v99_v31, %v93_v39  ;;  %v107_v41 = vmul.f32 %v103_v32, %v92_v38 }
 0x1ca   :  { %108 = vst [vmem:[#allocation2] sm:$0x7] %v106_v40  ;;  %109 = vst [vmem:[#allocation2 + $0x8] sm:$0x7] %v107_v41  ;;  %v258_v45 = vpop.permute.xlu1 %257 }
 0x1cb   :  { %v262_v47 = vsel %vm261_vm6, %v258_v45, %v260_v34  ;;  %v263_v49 = vsel %vm261_vm6, %v260_v34, %v258_v45 }
 0x1cc   :  { %v277_v51 = vmul.f32 %v270_v42, %v262_v47  ;;  %v278_v52 = vmul.f32 %v274_v43, %v263_v49 }
 0x1ce   :  { %v281_v56 = vrot.slane %v277_v51, 6  ;;  %v282_v57 = vrot.slane %v278_v52, 6  ;;  %v288_v58 = vpop.permute.xlu1 %287 }
 0x1cf   :  { %v292_v59 = vsel %vm291_vm7, %v288_v58, %v290_v50  ;;  %v293_v60 = vsel %vm291_vm7, %v290_v50, %v288_v58  ;;  %v346_v1 = vld [vmem:[#allocation2 + $0x18] sm:$0xff]  ;;  %v345_v4 = vld [vmem:[#allocation2 + $0x10] sm:$0xff] }
 0x1d0   :  { %285 = vst [vmem:[#allocation2 + $0x20] sm:$0x1c] %v281_v56  ;;  %286 = vst [vmem:[#allocation2 + $0x28] sm:$0x1c] %v282_v57  ;;  %v307_v61 = vmul.f32 %v300_v53, %v292_v59  ;;  %v308_v62 = vmul.f32 %v304_v54, %v293_v60 }
 0x1d1   :  { %v344_v2 = vld [vmem:[#allocation2 + $0x8] sm:$0xff]  ;;  %v343_v3 = vld [vmem:[#allocation2] sm:$0xff] }
 0x1d2   :  { %v311_v6 = vrot.slane %v307_v61, 3  ;;  %v312_v7 = vrot.slane %v308_v62, 3  ;;  %v318_v8 = vpop.permute.xlu1 %317  ;;  %v1137_v9 = vpack.c.bf16 %v346_v1, %v344_v2  ;;  %v1139_v10 = vpack.c.bf16 %v345_v4, %v343_v3 }
 0x1d3   :  { %v322_v11 = vsel %vm321_vm8, %v318_v8, %v320_v5  ;;  %v323_v12 = vsel %vm321_vm8, %v320_v5, %v318_v8  ;;  %v361_v28 = vpop.permute.xlu0 %360 }
 0x1d4   :  { %315 = vst [vmem:[#allocation2 + $0x20] sm:$0xe0] %v311_v6  ;;  %316 = vst [vmem:[#allocation2 + $0x28] sm:$0xe0] %v312_v7  ;;  %v337_v13 = vmul.f32 %v330_v63, %v322_v11  ;;  %v338_v14 = vmul.f32 %v334_v0, %v323_v12  ;;  %1138 = vmatprep.subr.bf16.mxu0 %v1137_v9  ;;  %v512_v9 = vld [vmem:[%s1747_s6] sm:$0xff] }
 0x1d5   :  { %1140 = vmatpush1.bf16.msra.mxu0 %v1139_v10  ;;  %v530_v12 = vld [vmem:[%s1748_s7] sm:$0xff] }
 0x1d6   :  { %339 = vst [vmem:[#allocation2 + $0x30] sm:$0x7] %v337_v13  ;;  %340 = vst [vmem:[#allocation2 + $0x38] sm:$0x7] %v338_v14  ;;  %v513_v13 = vld [vmem:[%s1747_s6 + $0x8] sm:$0x1f] }
 0x1db   :  { %v348_v15 = vld [vmem:[#allocation2 + $0x28] sm:$0xff]  ;;  %v347_v17 = vld [vmem:[#allocation2 + $0x20] sm:$0xff] }
 0x1dd   :  { %v350_v16 = vld [vmem:[#allocation2 + $0x38] sm:$0x7]  ;;  %v349_v18 = vld [vmem:[#allocation2 + $0x30] sm:$0x7] }
 0x1de   :  { %v1141_v19 = vpack.c.bf16 %v350_v16, %v348_v15  ;;  %v1144_v20 = vpack.c.bf16 %v349_v18, %v347_v17  ;;  %v531_v16 = vld [vmem:[%s1748_s7 + $0x8] sm:$0x1f] }
 0x1e0   :  { %1143 = vmatprep.subr.msk.bf16.mxu0 %vm1142_vm10, %v1141_v19 }
 0x1e1   :  { %1146 = vmatpush1.bf16.msk.msra.mxu0 %vm1142_vm10, %v1144_v20  ;;  %v1128_v20 = vld [vmem:[%s1742_s1 + $0x4] ss:$8 sm:$0x3] }
 0x1e3   :  { %v356_v23 = vpop.permute.xlu1 %355 }
 0x1e4   :  { %1123 = vmatmul.mubr.msk.f32.vlgmr.msra.gmra.mrb[0].mxu0 %vm363_vm11, %v341_v21 }
 0x1e5   :  { %446 = vmatprep.mubr.f32.mxu0 %v1231_v46 }
 0x1e8   :  { %1124 = vmatmul.mubr.msk.f32.gmra.mrb[2].mxu0 %vm363_vm11, %v342_v22 }
 0x2b7   :  { %v442_v24 = vpop.f32.mrb[0].mxu0 }
 0x2b8   :  { %v443_v25 = vadd.f32 %v442_v24, %v356_v23  ;;  %v444_v26 = vpop.f32.mrb[1].mxu0 }
 0x2b9   :  { %v445_v27 = vadd.f32 %v444_v26, %v356_v23 }
 0x2ba   :  { %v457_v31 = vrot.slane %v443_v25, 5 }
 0x2bb   :  { %v458_v32 = vrot.slane %v445_v27, 5  ;;  %v448_v33 = vpop.f32.mrb[2].mxu0 }
 0x2bc   :  { %467 = vst [vmem:[#allocation3] sm:$0xf8] %v457_v31  ;;  %v449_v34 = vadd.f32 %v448_v33, %v361_v28  ;;  %v450_v35 = vpop.f32.mrb[3].mxu0 }
 0x2bd   :  { %468 = vst [vmem:[#allocation3 + $0x8] sm:$0xf8] %v458_v32  ;;  %v451_v36 = vadd.f32 %v450_v35, %v361_v28  ;;  %v739_v28 = vrot.slane %v1128_v20, %v1306_v30 }
 0x2be   :  { %v459_v37 = vrot.slane %v449_v34, 5 }
 0x2bf   :  { %v461_v38 = vrot.slane %v451_v36, 5 }
 0x2c0   :  { %v460_v39 = vsel %vm44_vm0, %v457_v31, %v459_v37 }
 0x2c1   :  { %469 = vst [vmem:[#allocation3 + $0x10] sm:$0x1f] %v460_v39  ;;  %v462_v40 = vsel %vm44_vm0, %v458_v32, %v461_v38  ;;  %v735_v32 = vrot.slane %v1128_v20, %v1304_v29 }
 0x2c2   :  { %470 = vst [vmem:[#allocation3 + $0x18] sm:$0x1f] %v462_v40 }
 0x2c3   :  { %v471_v41 = vld [vmem:[#allocation3] sm:$0xff] }
 0x2c4   :  { %v472_v42 = vld [vmem:[#allocation3 + $0x8] sm:$0xff]  ;;  %v486_v44 = vmul.f32 %v471_v41, %v471_v41 }
 0x2c5   :  { %v475_v43 = vadd.f32 %v472_v42, %v471_v41  ;;  %v487_v45 = vmul.f32 %v472_v42, %v472_v42 }
 0x2c7   :  { %476 = vadd.xlane.f32.xlu1 %v475_v43  ;;  %v490_v49 = vadd.f32 %v487_v45, %v486_v44 }
 0x2c8   :  { %v473_v47 = vld [vmem:[#allocation3 + $0x10] sm:$0x1f] }
 0x2c9   :  { %v474_v50 = vld [vmem:[#allocation3 + $0x18] sm:$0x1f]  ;;  %v479_v51 = vsel %vm478_vm12, %v473_v47, 0.0  ;;  %v488_v52 = vmul.f32 %v473_v47, %v473_v47 }
 0x2ca   :  { %v480_v53 = vsel %vm478_vm12, %v474_v50, 0.0  ;;  %v489_v54 = vmul.f32 %v474_v50, %v474_v50 }
 0x2cb   :  { %491 = vadd.xlane.f32.xlu1 %v490_v49  ;;  %v481_v55 = vadd.f32 %v480_v53, %v479_v51  ;;  %v493_v56 = vsel %vm478_vm12, %v488_v52, 0.0 }
 0x2cc   :  { %v494_v57 = vsel %vm478_vm12, %v489_v54, 0.0  ;;  %v977_v54 = vld [vmem:[%s1750_s9] sm:$0xff] }
 0x2cd   :  { %482 = vadd.xlane.f32.xlu0 %v481_v55  ;;  %v495_v58 = vadd.f32 %v494_v57, %v493_v56  ;;  %v978_v55 = vld [vmem:[%s1750_s9 + $0x8] sm:$0x3] }
 0x2ce   :  { %v1125_v56 = vld [vmem:[%s1742_s1 + $0x1] ss:$8 sm:$0x3] }
 0x2cf   :  { %v1496_v57 = vrot.slane %v1125_v56, %v1304_v29 }
 0x2d1   :  { %496 = vadd.xlane.f32.xlu0 %v495_v58  ;;  %v1499_v58 = vrot.slane %v1125_v56, %v1306_v30 }
 0x354   :  { %v477_v59 = vpop.xlane.xlu1 %476 }
 0x355   :  { %v484_v60 = vmul.f32 0.00390625, %v477_v59 }
 0x357   :  { %v500_v62 = vmul.f32 %v484_v60, %v484_v60  ;;  %v508_v18 = vsub.f32 %v471_v41, %v484_v60  ;;  %v509_v19 = vsub.f32 %v472_v42, %v484_v60 }
 0x358   :  { %v492_v61 = vpop.xlane.xlu1 %491 }
 0x359   :  { %v498_v63 = vmul.f32 0.00390625, %v492_v61 }
 0x35a   :  { %v483_v0 = vpop.xlane.xlu0 %482 }
 0x35b   :  { %v502_v1 = vsub.f32 %v498_v63, %v500_v62  ;;  %v485_v2 = vmul.f32 0.00390625, %v483_v0 }
 0x35d   :  { %v504_v3 = vadd.f32 1e-05, %v502_v1  ;;  %v501_v5 = vmul.f32 %v485_v2, %v485_v2  ;;  %v510_v24 = vsub.f32 %v473_v47, %v485_v2  ;;  %v511_v27 = vsub.f32 %v474_v50, %v485_v2  ;;  %v562_v1 = vld [vmem:[%s1742_s1] ss:$8 sm:$0x3] }
 0x35e   :  { %v497_v4 = vpop.xlane.xlu0 %496 }
 0x35f   :  { %1194 = vrsqrt.f32 %v504_v3  ;;  %v499_v6 = vmul.f32 0.00390625, %v497_v4 }
 0x361   :  { %v503_v7 = vsub.f32 %v499_v6, %v501_v5  ;;  %v567_v6 = vrot.slane %v562_v1, %v1304_v29 }
 0x363   :  { %v505_v8 = vadd.f32 1e-05, %v503_v7  ;;  %v571_v7 = vrot.slane %v562_v1, %v1306_v30 }
 0x365   :  { %1196 = vrsqrt.f32 %v505_v8  ;;  %v1126_v8 = vld [vmem:[%s1742_s1 + $0x2] ss:$8 sm:$0x3] }
 0x369   :  { %v1195_v10 = vpop.eup %1194 }
 0x36a   :  { %v514_v11 = vmul.f32 %v1195_v10, %v512_v9 }
 0x36c   :  { %518 = vperm.xlu1 %1189, %v514_v11  }
 0x36f   :  { %v1197_v14 = vpop.eup %1196 }
 0x370   :  { %534 = vperm.xlu1 %1189, %v530_v12   ;;  %v515_v15 = vmul.f32 %v1197_v14, %v513_v13 }
 0x372   :  { %523 = vperm.xlu0 %1190, %v515_v15   ;;  %v1530_v15 = vrot.slane %v1126_v8, %v1304_v29 }
 0x374   :  { %539 = vperm.xlu1 %1189, %v531_v16   ;;  %v1533_v16 = vrot.slane %v1126_v8, %v1306_v30 }
 0x3eb   :  { %v519_v17 = vpop.permute.xlu1 %518 }
 0x3ec   :  { %v526_v21 = vmul.f32 %v519_v17, %v508_v18  ;;  %v527_v22 = vmul.f32 %v519_v17, %v509_v19 }
 0x3ef   :  { %v535_v23 = vpop.permute.xlu1 %534 }
 0x3f0   :  { %v542_v25 = vadd.f32 %v535_v23, %v526_v21  ;;  %v543_v26 = vadd.f32 %v535_v23, %v527_v22 }
 0x3f1   :  { %v524_v31 = vpop.permute.xlu0 %523 }
 0x3f2   :  { %v546_v33 = vmax.f32 %v542_v25, 0.0  ;;  %v547_v34 = vmax.f32 %v543_v26, 0.0  ;;  %v528_v35 = vmul.f32 %v524_v31, %v510_v24  ;;  %v529_v36 = vmul.f32 %v524_v31, %v511_v27  ;;  %v1127_v27 = vld [vmem:[%s1742_s1 + $0x3] ss:$8 sm:$0x3] }
 0x3f3   :  { %v540_v37 = vpop.permute.xlu1 %539 }
 0x3f4   :  { %v544_v38 = vadd.f32 %v540_v37, %v528_v35  ;;  %v545_v39 = vadd.f32 %v540_v37, %v529_v36  ;;  %586 = vrot.lane.b32.xlu1 %v547_v34, %s1223_s2  ;;  %582 = vrot.lane.b32.xlu0 %v546_v33, %s1223_s2  ;;  %v743_v40 = vmul.f32 %v739_v28, %v547_v34 }
 0x3f5   :  { %v742_v41 = vmul.f32 %v735_v32, %v546_v33  ;;  %v700_v35 = vrot.slane %v1127_v27, %v1306_v30 }
 0x3f6   :  { %v548_v42 = vmax.f32 %v544_v38, 0.0  ;;  %v549_v43 = vmax.f32 %v545_v39, 0.0  ;;  %v752_v44 = vrot.slane %v743_v40, 4 }
 0x3f7   :  { %v751_v45 = vrot.slane %v742_v41, 4 }
 0x3f8   :  { %636 = vrot.lane.b32.xlu1 %v547_v34, %s1224_s3  ;;  %550 = vrot.lane.b32.xlu0 %v546_v33, %s1226_s21  ;;  %v745_v47 = vmul.f32 %v739_v28, %v549_v43  ;;  %764 = vst [vmem:[#allocation2 + $0x68] sm:$0xf0] %v752_v44  ;;  %v744_v49 = vmul.f32 %v735_v32, %v548_v42 }
 0x3f9   :  { %763 = vst [vmem:[#allocation2 + $0x60] sm:$0xf0] %v751_v45 }
 0x3fa   :  { %v755_v50 = vrot.slane %v745_v47, 4  ;;  %v753_v51 = vrot.slane %v744_v49, 4 }
 0x3fc   :  { %554 = vrot.lane.b32.xlu0 %v547_v34, %s1226_s21  ;;  %552 = vrot.lane.b32.xlu1 %v548_v42, %s1226_s21  ;;  %v1456_v52 = vsel %vm750_vm13, %v752_v44, %v755_v50  ;;  %768 = vst [vmem:[#allocation2 + $0x88] sm:$0x1] %v755_v50  ;;  %v1458_v53 = vsel %vm750_vm13, %v751_v45, %v753_v51  ;;  %767 = vst [vmem:[#allocation2 + $0x80] sm:$0x1] %v753_v51 }
 0x3fd   :  { %v1129_v44 = vld [vmem:[%s1742_s1 + $0x5] ss:$8 sm:$0x3] }
 0x3fe   :  { %v1585_v56 = vrot.slane %v1129_v44, %v1306_v30 }
 0x400   :  { %632 = vrot.lane.b32.xlu0 %v546_v33, %s1224_s3  ;;  %556 = vrot.lane.b32.xlu1 %v549_v43, %s1226_s21 }
 0x404   :  { %679 = vrot.lane.b32.xlu0 %v546_v33, %s1227_s22  ;;  %588 = vrot.lane.b32.xlu1 %v549_v43, %s1223_s2 }
 0x408   :  { %683 = vrot.lane.b32.xlu0 %v547_v34, %s1227_s22  ;;  %820 = vrot.lane.b32.xlu1 %v547_v34, %s1228_s23 }
 0x40c   :  { %769 = vrot.lane.b32.xlu0 %v546_v33, %s1225_s20  ;;  %871 = vrot.lane.b32.xlu1 %v547_v34, %s1229_s24 }
 0x410   :  { %773 = vrot.lane.b32.xlu0 %v547_v34, %s1225_s20  ;;  %638 = vrot.lane.b32.xlu1 %v549_v43, %s1224_s3 }
 0x414   :  { %584 = vrot.lane.b32.xlu0 %v548_v42, %s1223_s2  ;;  %681 = vrot.lane.b32.xlu1 %v548_v42, %s1227_s22 }
 0x418   :  { %634 = vrot.lane.b32.xlu0 %v548_v42, %s1224_s3  ;;  %685 = vrot.lane.b32.xlu1 %v549_v43, %s1227_s22 }
 0x41c   :  { %816 = vrot.lane.b32.xlu0 %v546_v33, %s1228_s23  ;;  %771 = vrot.lane.b32.xlu1 %v548_v42, %s1225_s20 }
 0x420   :  { %867 = vrot.lane.b32.xlu0 %v546_v33, %s1229_s24  ;;  %775 = vrot.lane.b32.xlu1 %v549_v43, %s1225_s20 }
 0x424   :  { %818 = vrot.lane.b32.xlu0 %v548_v42, %s1228_s23  ;;  %822 = vrot.lane.b32.xlu1 %v549_v43, %s1228_s23 }
 0x428   :  { %869 = vrot.lane.b32.xlu0 %v548_v42, %s1229_s24  ;;  %873 = vrot.lane.b32.xlu1 %v549_v43, %s1229_s24 }
 0x42c   :  { %913 = vrot.lane.b32.xlu0 %v546_v33, %s1230_s25  ;;  %917 = vrot.lane.b32.xlu1 %v547_v34, %s1230_s25  ;;  %v696_v34 = vrot.slane %v1127_v27, %v1304_v29 }
 0x430   :  { %915 = vrot.lane.b32.xlu0 %v548_v42, %s1230_s25  ;;  %919 = vrot.lane.b32.xlu1 %v549_v43, %s1230_s25 }
 0x434   :  { %981 = vperm.xlu0 %1190, %v977_v54   ;;  %986 = vperm.xlu1 %1189, %v978_v55   ;;  %v1582_v55 = vrot.slane %v1129_v44, %v1304_v29 }
 0x466   :  { %v587_v59 = vpop.permute.xlu1 %586  ;;  %v583_v60 = vpop.permute.xlu0 %582 }
 0x467   :  { %v590_v61 = vsel %vm114_vm1, %v583_v60, %v587_v59  ;;  %v592_v62 = vsel %vm114_vm1, %v587_v59, %v583_v60 }
 0x468   :  { %v1506_v63 = vmul.f32 %v1496_v57, %v592_v62  ;;  %v1509_v0 = vmul.f32 %v1499_v58, %v590_v61 }
 0x46a   :  { %v614_v2 = vrot.slane %v1506_v63, 3  ;;  %v615_v3 = vrot.slane %v1509_v0, 3  ;;  %v637_v4 = vpop.permute.xlu1 %636  ;;  %v551_v5 = vpop.permute.xlu0 %550 }
 0x46c   :  { %626 = vst [vmem:[#allocation2 + $0x10] sm:$0xe0] %v614_v2  ;;  %627 = vst [vmem:[#allocation2 + $0x18] sm:$0xe0] %v615_v3 }
 0x46e   :  { %v553_v9 = vpop.permute.xlu1 %552  ;;  %v555_v10 = vpop.permute.xlu0 %554 }
 0x46f   :  { %v558_v11 = vsel %vm91_vm5, %v551_v5, %v555_v10  ;;  %v560_v12 = vsel %vm91_vm5, %v555_v10, %v551_v5 }
 0x470   :  { %v574_v13 = vmul.f32 %v567_v6, %v560_v12  ;;  %v575_v14 = vmul.f32 %v571_v7, %v558_v11  ;;  %v1130_v11 = vld [vmem:[%s1742_s1 + $0x6] ss:$8 sm:$0x3] }
 0x472   :  { %578 = vst [vmem:[#allocation2] sm:$0xff] %v574_v13  ;;  %579 = vst [vmem:[#allocation2 + $0x8] sm:$0xff] %v575_v14  ;;  %v557_v17 = vpop.permute.xlu1 %556  ;;  %v633_v18 = vpop.permute.xlu0 %632 }
 0x473   :  { %v559_v19 = vsel %vm91_vm5, %v553_v9, %v557_v17  ;;  %v561_v20 = vsel %vm91_vm5, %v557_v17, %v553_v9  ;;  %v640_v21 = vsel %vm144_vm2, %v633_v18, %v637_v4  ;;  %v642_v22 = vsel %vm144_vm2, %v637_v4, %v633_v18 }
 0x474   :  { %v576_v23 = vmul.f32 %v567_v6, %v561_v20  ;;  %v577_v24 = vmul.f32 %v571_v7, %v559_v19  ;;  %v1544_v25 = vmul.f32 %v1530_v15, %v642_v22  ;;  %v1547_v26 = vmul.f32 %v1533_v16, %v640_v21 }
 0x475   :  { %v1613_v20 = vrot.slane %v1130_v11, %v1304_v29  ;;  %v1616_v21 = vrot.slane %v1130_v11, %v1306_v30 }
 0x476   :  { %580 = vst [vmem:[#allocation2 + $0x10] sm:$0x1f] %v576_v23  ;;  %581 = vst [vmem:[#allocation2 + $0x18] sm:$0x1f] %v577_v24  ;;  %v665_v28 = vrot.slane %v1544_v25, 6  ;;  %v666_v31 = vrot.slane %v1547_v26, 6  ;;  %v589_v32 = vpop.permute.xlu1 %588  ;;  %v680_v33 = vpop.permute.xlu0 %679 }
 0x477   :  { %v1131_v24 = vld [vmem:[%s1742_s1 + $0x7] ss:$8 sm:$0x3] }
 0x478   :  { %675 = vst [vmem:[#allocation2 + $0x30] sm:$0xfc] %v665_v28  ;;  %676 = vst [vmem:[#allocation2 + $0x38] sm:$0xfc] %v666_v31  ;;  %v1641_v0 = vrot.slane %v1131_v24, %v1304_v29 }
 0x47a   :  { %v1560_v36 = vpop.permute.xlu1 %820  ;;  %v684_v37 = vpop.permute.xlu0 %683 }
 0x47b   :  { %v687_v38 = vsel %vm176_vm3, %v680_v33, %v684_v37  ;;  %v689_v39 = vsel %vm176_vm3, %v684_v37, %v680_v33 }
 0x47c   :  { %v1566_v40 = vmul.f32 %v696_v34, %v689_v39  ;;  %v1568_v41 = vmul.f32 %v700_v35, %v687_v38 }
 0x47d   :  { %v950_v42 = vld [vmem:[#allocation2 + $0x18] sm:$0xff]  ;;  %v949_v43 = vld [vmem:[#allocation2 + $0x10] sm:$0xff] }
 0x47e   :  { %v712_v45 = vrot.slane %v1566_v40, 1  ;;  %v713_v47 = vrot.slane %v1568_v41, 1  ;;  %v1575_v49 = vpop.permute.xlu1 %871  ;;  %v770_v50 = vpop.permute.xlu0 %769  ;;  %v1147_v51 = vpack.c.bf16 %v950_v42, %v575_v14  ;;  %v1149_v54 = vpack.c.bf16 %v949_v43, %v574_v13 }
 0x480   :  { %724 = vst [vmem:[#allocation2 + $0x40] sm:$0x80] %v712_v45  ;;  %725 = vst [vmem:[#allocation2 + $0x48] sm:$0x80] %v713_v47  ;;  %1148 = vmatprep.subr.bf16.mxu1 %v1147_v51 }
 0x481   :  { %1150 = vmatpush1.bf16.msra.mxu1 %v1149_v54 }
 0x482   :  { %v639_v59 = vpop.permute.xlu1 %638  ;;  %v774_v60 = vpop.permute.xlu0 %773 }
 0x483   :  { %v777_v61 = vsel %vm229_vm4, %v770_v50, %v774_v60  ;;  %v779_v62 = vsel %vm229_vm4, %v774_v60, %v770_v50 }
 0x484   :  { %v1592_v1 = vmul.f32 %v1582_v55, %v777_v61  ;;  %v1595_v4 = vmul.f32 %v1585_v56, %v779_v62 }
 0x486   :  { %v802_v5 = vrot.slane %v1592_v1, 7  ;;  %v803_v6 = vrot.slane %v1595_v4, 7  ;;  %v682_v7 = vpop.permute.xlu1 %681  ;;  %v585_v8 = vpop.permute.xlu0 %584 }
 0x487   :  { %v591_v9 = vsel %vm114_vm1, %v585_v8, %v589_v32  ;;  %v593_v10 = vsel %vm114_vm1, %v589_v32, %v585_v8  ;;  %vm801_vm1 = vcmask 1040384  }
 0x488   :  { %812 = vst [vmem:[#allocation2 + $0x80] sm:$0xfe] %v802_v5  ;;  %813 = vst [vmem:[#allocation2 + $0x88] sm:$0xfe] %v803_v6  ;;  %v608_v12 = vmul.f32 %v1496_v57, %v593_v10  ;;  %v609_v13 = vmul.f32 %v1499_v58, %v591_v9 }
 0x48a   :  { %v616_v14 = vrot.slane %v608_v12, 3  ;;  %v618_v17 = vrot.slane %v609_v13, 3  ;;  %v686_v18 = vpop.permute.xlu1 %685  ;;  %v635_v19 = vpop.permute.xlu0 %634 }
 0x48b   :  { %v688_v22 = vsel %vm176_vm3, %v682_v7, %v686_v18  ;;  %v690_v23 = vsel %vm176_vm3, %v686_v18, %v682_v7  ;;  %v641_v57 = vsel %vm144_vm2, %v635_v19, %v639_v59  ;;  %v643_v58 = vsel %vm144_vm2, %v639_v59, %v635_v19 }
 0x48c   :  { %v1632_v27 = vsel %vm478_vm12, %v614_v2, %v616_v14  ;;  %v619_v32 = vsel %vm478_vm12, %v615_v3, %v618_v17  ;;  %630 = vst [vmem:[#allocation2 + $0x30] sm:$0x3] %v616_v14  ;;  %631 = vst [vmem:[#allocation2 + $0x38] sm:$0x3] %v618_v17  ;;  %v705_v33 = vmul.f32 %v696_v34, %v690_v23  ;;  %vm848_vm2 = vcmask 1045504  }
 0x48d   :  { %v706_v37 = vmul.f32 %v700_v35, %v688_v22  ;;  %628 = vst [vmem:[#allocation2 + $0x20] sm:$0xff] %v1632_v27  ;;  %629 = vst [vmem:[#allocation2 + $0x28] sm:$0xff] %v619_v32  ;;  %v658_v38 = vmul.f32 %v1530_v15, %v643_v58  ;;  %v659_v63 = vmul.f32 %v1533_v16, %v641_v57 }
 0x48e   :  { %v714_v39 = vrot.slane %v705_v33, 1  ;;  %v772_v42 = vpop.permute.xlu1 %771  ;;  %v817_v43 = vpop.permute.xlu0 %816  ;;  %v1644_v3 = vrot.slane %v1131_v24, %v1306_v30 }
 0x48f   :  { %v716_v2 = vrot.slane %v706_v37, 1  ;;  %v667_v34 = vrot.slane %v658_v38, 6  ;;  %v669_v35 = vrot.slane %v659_v63, 6  ;;  %v824_v44 = vsel %vm261_vm6, %v817_v43, %v1560_v36 }
 0x490   :  { %v826_v15 = vsel %vm261_vm6, %v1560_v36, %v817_v43  ;;  %v1654_v16 = vsel %vm711_vm14, %v712_v45, %v714_v39  ;;  %728 = vst [vmem:[#allocation2 + $0x60] sm:$0xf] %v714_v39  ;;  %v840_v51 = vmul.f32 %v1613_v20, %v824_v44 }
 0x491   :  { %v1658_v50 = vsel %vm711_vm14, %v713_v47, %v716_v2  ;;  %729 = vst [vmem:[#allocation2 + $0x68] sm:$0xf] %v716_v2  ;;  %v841_v54 = vmul.f32 %v1616_v21, %v826_v15  ;;  %v668_v59 = vsel %vm664_vm15, %v665_v28, %v667_v34  ;;  %v670_v36 = vsel %vm664_vm15, %v666_v31, %v669_v35 }
 0x492   :  { %677 = vst [vmem:[#allocation2 + $0x40] sm:$0x7f] %v668_v59  ;;  %678 = vst [vmem:[#allocation2 + $0x48] sm:$0x7f] %v670_v36  ;;  %v849_v40 = vrot.slane %v840_v51, 2  ;;  %v776_v45 = vpop.permute.xlu1 %775  ;;  %v868_v47 = vpop.permute.xlu0 %867  ;;  %v964_v51 = vld [vmem:[#allocation2 + $0x88] sm:$0xff] }
 0x493   :  { %v850_v41 = vrot.slane %v841_v54, 2  ;;  %v778_v60 = vsel %vm229_vm4, %v772_v42, %v776_v45  ;;  %v780_v61 = vsel %vm229_vm4, %v776_v45, %v772_v42  ;;  %v875_v25 = vsel %vm291_vm7, %v868_v47, %v1575_v49  ;;  %v954_v28 = vld [vmem:[#allocation2 + $0x38] sm:$0xff]  ;;  %v953_v31 = vld [vmem:[#allocation2 + $0x30] sm:$0xff] }
 0x494   :  { %v877_v26 = vsel %vm291_vm7, %v1575_v49, %v868_v47  ;;  %861 = vst [vmem:[#allocation2 + $0x90] sm:$0xc0] %v849_v40  ;;  %v795_v62 = vmul.f32 %v1582_v55, %v778_v60  ;;  %v796_v7 = vmul.f32 %v1585_v56, %v780_v61  ;;  %v891_v8 = vmul.f32 %v1641_v0, %v875_v25  ;;  %v1132_v49 = vld [vmem:[%s1742_s1 + $0x10] ss:$8 sm:$0x3] }
 0x495   :  { %862 = vst [vmem:[#allocation2 + $0x98] sm:$0xc0] %v850_v41  ;;  %v892_v9 = vmul.f32 %v1644_v3, %v877_v26  ;;  %v1151_v10 = vpack.c.bf16 %v954_v28, %v619_v32  ;;  %v1153_v11 = vpack.c.bf16 %v953_v31, %v1632_v27  ;;  %v930_v33 = vrot.slane %v1132_v49, %v1304_v29 }
 0x496   :  { %v804_v12 = vrot.slane %v795_v62, 7  ;;  %v806_v13 = vrot.slane %v796_v7, 7  ;;  %v899_v14 = vrot.slane %v891_v8, 5  ;;  %v823_v18 = vpop.permute.xlu1 %822  ;;  %v819_v55 = vpop.permute.xlu0 %818  ;;  %v934_v39 = vrot.slane %v1132_v49, %v1306_v30 }
 0x497   :  { %v900_v17 = vrot.slane %v892_v9, 5  ;;  %v825_v56 = vsel %vm261_vm6, %v819_v55, %v823_v18  ;;  %v827_v19 = vsel %vm261_vm6, %v823_v18, %v819_v55  ;;  %1152 = vmatprep.subr.bf16.mxu1 %v1151_v10  ;;  %v959_v34 = vld [vmem:[#allocation2 + $0x60] sm:$0xff] }
 0x498   :  { %v805_v22 = vsel %vm801_vm1, %v802_v5, %v804_v12  ;;  %v807_v23 = vsel %vm801_vm1, %v803_v6, %v806_v13  ;;  %909 = vst [vmem:[#allocation2 + $0xb0] sm:$0xf8] %v899_v14  ;;  %v842_v57 = vmul.f32 %v1613_v20, %v825_v56  ;;  %v843_v58 = vmul.f32 %v1616_v21, %v827_v19  ;;  %v960_v24 = vld [vmem:[#allocation2 + $0x68] sm:$0xff] }
 0x499   :  { %910 = vst [vmem:[#allocation2 + $0xb8] sm:$0xf8] %v900_v17  ;;  %1154 = vmatpush1.bf16.msra.mxu1 %v1153_v11  ;;  %814 = vst [vmem:[#allocation2 + $0x90] sm:$0x3f] %v805_v22  ;;  %v956_v27 = vld [vmem:[#allocation2 + $0x48] sm:$0xff]  ;;  %v955_v32 = vld [vmem:[#allocation2 + $0x40] sm:$0xff]  ;;  %v1159_v63 = vpack.c.bf16 %v1456_v52, %v960_v24 }
 0x49a   :  { %815 = vst [vmem:[#allocation2 + $0x98] sm:$0x3f] %v807_v23  ;;  %v851_v1 = vrot.slane %v842_v57, 2  ;;  %v853_v5 = vrot.slane %v843_v58, 2  ;;  %v874_v37 = vpop.permute.xlu1 %873  ;;  %v870_v4 = vpop.permute.xlu0 %869  ;;  %v1155_v6 = vpack.c.bf16 %v1658_v50, %v956_v27  ;;  %v1157_v38 = vpack.c.bf16 %v1654_v16, %v955_v32  ;;  %v946_v12 = vld [vmem:[%s1749_s8 + $0x8] sm:$0x3] }
 0x49b   :  { %v876_v20 = vsel %vm291_vm7, %v870_v4, %v874_v37  ;;  %v878_v21 = vsel %vm291_vm7, %v874_v37, %v870_v4  ;;  %v1161_v50 = vpack.c.bf16 %v1458_v53, %v959_v34  ;;  %s1198_s8 = scalar_lea.vmem %s1103_s17, 768 }
 0x49c   :  { %v852_v2 = vsel %vm848_vm2, %v849_v40, %v851_v1  ;;  %v854_v29 = vsel %vm848_vm2, %v850_v41, %v853_v5  ;;  %865 = vst [vmem:[#allocation2 + $0xb0] sm:$0x7] %v851_v1  ;;  %866 = vst [vmem:[#allocation2 + $0xb8] sm:$0x7] %v853_v5  ;;  %v893_v42 = vmul.f32 %v1641_v0, %v876_v20  ;;  %1156 = vmatprep.subr.bf16.mxu1 %v1155_v6  ;;  %v963_v40 = vld [vmem:[#allocation2 + $0x80] sm:$0xff]  ;;  %p1199_p0 = scmp.ne.s32.totalorder %s1103_s17, %s1198_s8  ;;  %p1204_p2 = scmp.lt.s32.totalorder %s1198_s8, %s1198_s8 }
 0x49d   :  { %v894_v43 = vmul.f32 %v1644_v3, %v878_v21  ;;  %1158 = vmatpush1.bf16.msra.mxu1 %v1157_v38 }
 0x49e   :  { %v901_v35 = vrot.slane %v893_v42, 5  ;;  %1160 = vmatprep.subr.bf16.mxu1 %v1159_v63  ;;  %v918_v15 = vpop.permute.xlu1 %917  ;;  %v914_v16 = vpop.permute.xlu0 %913  ;;  %p1205_p3 = por %p1204_p2, %p1203_p1 }
 0x49f   :  { %v903_v44 = vrot.slane %v894_v43, 5  ;;  %v921_v52 = vsel %vm321_vm8, %v914_v16, %v918_v15  ;;  %v923_v30 = vsel %vm321_vm8, %v918_v15, %v914_v16 }
 0x4a0   :  { %v902_v0 = vsel %vm44_vm0, %v899_v14, %v901_v35  ;;  %v937_v54 = vmul.f32 %v930_v33, %v921_v52  ;;  %v938_v59 = vmul.f32 %v934_v39, %v923_v30  ;;  %v965_v41 = vld [vmem:[#allocation2 + $0x90] sm:$0xff]  ;;  %p1206_p4 = pnand %p1205_p3, %p1199_p0 }
 0x4a1   :  { %v904_v3 = vsel %vm44_vm0, %v900_v17, %v903_v44  ;;  %v966_v36 = vld [vmem:[#allocation2 + $0x98] sm:$0xff]  ;;  %1162 = vmatpush1.bf16.msra.mxu1 %v1161_v50  ;;  %v1165_v47 = vpack.c.bf16 %v965_v41, %v963_v40  ;;  %vm989_vm0 = vcmask 957440  }
 0x4a2   :  { %v1163_v45 = vpack.c.bf16 %v966_v36, %v964_v51  ;;  %v920_v60 = vpop.permute.xlu1 %919  ;;  %v916_v61 = vpop.permute.xlu0 %915  ;;  %v1171_v9 = vpack.c.bf16 %v938_v59, %v904_v3  ;;  %v1173_v10 = vpack.c.bf16 %v937_v54, %v902_v0 }
 0x4a3   :  { %v922_v25 = vsel %vm321_vm8, %v916_v61, %v920_v60  ;;  %v924_v53 = vsel %vm321_vm8, %v920_v60, %v916_v61  ;;  %v970_v26 = vld [vmem:[#allocation2 + $0xb8] sm:$0xff]  ;;  %v969_v7 = vld [vmem:[#allocation2 + $0xb0] sm:$0xff] }
 0x4a4   :  { %1164 = vmatprep.subr.bf16.mxu1 %v1163_v45  ;;  %v939_v28 = vmul.f32 %v930_v33, %v922_v25  ;;  %v940_v31 = vmul.f32 %v934_v39, %v924_v53  ;;  %v1167_v62 = vpack.c.bf16 %v970_v26, %v854_v29  ;;  %v1169_v8 = vpack.c.bf16 %v969_v7, %v852_v2 }
 0x4a5   :  { %1166 = vmatpush1.bf16.msra.mxu1 %v1165_v47 }
 0x4a6   :  { %943 = vst [vmem:[#allocation2 + $0xe0] sm:$0x1f] %v939_v28  ;;  %944 = vst [vmem:[#allocation2 + $0xe8] sm:$0x1f] %v940_v31  ;;  %1168 = vmatprep.subr.bf16.mxu1 %v1167_v62 }
 0x4a9   :  { %1170 = vmatpush1.bf16.msra.mxu1 %v1169_v8 }
 0x4aa   :  { %1172 = vmatprep.subr.bf16.mxu1 %v1171_v9 }
 0x4ad   :  { %1174 = vmatpush1.bf16.msra.mxu1 %v1173_v10  ;;  %v976_v11 = vld [vmem:[#allocation2 + $0xe8] sm:$0x1f]  ;;  %v975_v49 = vld [vmem:[#allocation2 + $0xe0] sm:$0x1f] }
 0x4ae   :  { %1133 = vmatprep.subr.msk.mxu1 %vm478_vm12, %v976_v11 }
 0x4b1   :  { %1134 = vmatpush1.msk.msra.mxu1 %vm478_vm12, %v975_v49 }
 0x4b2   :  { %1135 = vmatmul.mubr.msk.f32.vlgmr.msra.gmra.mrb[0].mxu1 %vm989_vm0, %v945_v48 }
 0x4b3   :  { %1072 = vmatprep.mubr.f32.mxu1 %v1231_v46  ;;  %v982_v13 = vpop.permute.xlu0 %981  ;;  %v987_v19 = vpop.permute.xlu1 %986 }
 0x4b6   :  { %1136 = vmatmul.mubr.msk.f32.gmra.mrb[2].mxu1 %vm989_vm0, %v946_v12 }
 0x585   :  { %v1068_v14 = vpop.f32.mrb[0].mxu1 }
 0x586   :  { %v1069_v17 = vadd.f32 %v1068_v14, %v982_v13  ;;  %v1070_v18 = vpop.f32.mrb[1].mxu1 }
 0x587   :  { %v1071_v55 = vadd.f32 %v1070_v18, %v982_v13 }
 0x588   :  { %v1083_v56 = vrot.slane %v1069_v17, 3 }
 0x589   :  { %v1084_v22 = vrot.slane %v1071_v55, 3  ;;  %v1074_v23 = vpop.f32.mrb[2].mxu1 }
 0x58a   :  { %1093 = vst [vmem:[#allocation3 + $0x10] sm:$0xe0] %v1083_v56  ;;  %v1075_v57 = vadd.f32 %v1074_v23, %v987_v19  ;;  %v1076_v58 = vpop.f32.mrb[3].mxu1 }
 0x58b   :  { %1094 = vst [vmem:[#allocation3 + $0x18] sm:$0xe0] %v1084_v22  ;;  %v1077_v46 = vadd.f32 %v1076_v58, %v987_v19 }
 0x58c   :  { %v1085_v24 = vrot.slane %v1075_v57, 3 }
 0x58d   :  { %v1087_v27 = vrot.slane %v1077_v46, 3 }
 0x58e   :  { %v1086_v32 = vsel %vm478_vm12, %v1083_v56, %v1085_v24 }
 0x58f   :  { %1095 = vst [vmem:[#allocation3 + $0x20] sm:$0x7f] %v1086_v32  ;;  %v1088_v33 = vsel %vm478_vm12, %v1084_v22, %v1087_v27 }
 0x590   :  { %1096 = vst [vmem:[#allocation3 + $0x28] sm:$0x7f] %v1088_v33 }
 0x591   :  { %1209 = shalt.err (!%p1206_p4)
}
 0x592   :  { %s1210_s26 = scalar_lea.hbm %s1751_s10, 768 }
 0x593   :  { %p1211_p5 = scmp.ne.s32.totalorder %s1751_s10, %s1210_s26  ;;  %p1214_p6 = scmp.lt.u32.totalorder %s1210_s26, %s1751_s10 }
 0x595   :  { %p1216_p7 = pnand %p1214_p6, %p1211_p5 }
 0x597   :  { %1219 = shalt.err (!%p1216_p7)
}
 0x598   :  { %s1234_s20 = smov 256   ;;  %s1235_s21 = smov 16  }
 0x599   :  { %1108 = dma.vmem_to_hbm [thread:$0]  %s1103_s17, 768, %s1751_s10, [#allocation4], %s1234_s20, %s1234_s20, %s1235_s21  }
 0x59a   :  { %1220 = dma.done.wait [#allocation4], 768  }
 0x59b   :  { %1221 = vsyncadd [#allocation4], 4294966528 }
 0x59c   :  { %1112 = vsyncpa [#allocation4], 1 }

</bundles_post_ra>
